<compile_context>
chip_gen: v5e
topology: v5e:2x2
jax: 0.10.0
libtpu: 0.0.40
codegen_flags: <defaults>
</compile_context>

<pallas_src>
import functools

import jax
import jax.numpy as jnp
from jax.experimental import pallas as pl
from jax.experimental.pallas import tpu as pltpu


def _round_up(x: int, m: int) -> int:
    return ((x + m - 1) // m) * m


def _largest_divisor_leq(n: int, cap: int) -> int:
    cap = max(1, min(cap, n))
    for d in range(cap, 0, -1):
        if n % d == 0:
            return d
    return 1


def _gcn_kernel(adj_ref, hid_ref, b_ref, out_ref, acc_ref, *, den_lane, approx):
    """One grid step (batch-block b, row-tile i, contraction-tile k).

    adj_ref : (bb, bm, bk)        adjacency block (row-tile i, col/k-tile k)
    hid_ref : (bb, bk, F_acc)     k-tile of [text @ W | 1 | 0-pad]   (lane-dense)
    b_ref   : (1, F_out_p)        resident bias (f32)
    out_ref : (bb, bm, F_out_p)   written only on the last k step
    acc_ref : (bb, bm, F_acc) f32 accumulator; lane `den_lane` carries row_sum(adj)
    """
    k = pl.program_id(2)
    nk = pl.num_programs(2)

    @pl.when(k == 0)
    def _init():
        acc_ref[...] = jnp.zeros_like(acc_ref)

    # Single MXU pass per k-tile; the appended ones-column of hid produces the
    # adjacency row-sum in lane `den_lane` for free (no XLU reduce, no den scratch).
    acc_ref[...] += jnp.einsum(
        "bmk,bkf->bmf", adj_ref[...], hid_ref[...],
        preferred_element_type=jnp.float32)

    @pl.when(k == nk - 1)
    def _finalize():
        acc = acc_ref[...]
        f_out_p = out_ref.shape[-1]
        denom = acc[:, :, den_lane:den_lane + 1] + 1.0
        recip = pl.reciprocal(denom, approx=approx)        # EUP slot when approx
        out_ref[...] = (acc[:, :, :f_out_p] * recip + b_ref[...]).astype(out_ref.dtype)


def graph_convolution(text, adj, weight, bias=None, *,
                      block_b: int = 8, block_n: int = 256,
                      compute_dtype=jnp.bfloat16):
    """GCN layer forward.

    text: (B, N, F_in), adj: (B, N, N), weight: (F_in, F_out), bias: (F_out,) or None.
    Returns (B, N, F_out) in text's dtype. Accumulation is always f32.
    compute_dtype controls the streaming dtype of adj/hidden (default bf16;
    use jnp.float32 for exact parity with the f32 reference).
    """
    B, N, F_in = text.shape
    assert adj.shape == (B, N, N), "adj must be (B, N, N)"
    assert weight.shape[0] == F_in, "weight must be (F_in, F_out)"
    assert block_n % 128 == 0 and block_n >= 128, "block_n must be a multiple of 128"
    F_out = weight.shape[1]
    out_dtype = text.dtype

    if bias is None:
        bias = jnp.zeros((F_out,), dtype=jnp.float32)

    kernel_dtype = jnp.dtype(out_dtype if compute_dtype is None else compute_dtype)
    exact = kernel_dtype == jnp.dtype(jnp.float32)

    # hidden = text @ W hoisted out of the kernel (O(B*N*F_in*F_out), tiny vs. the
    # O(B*N^2*F_out) aggregation); a ones-column is appended so adj @ [hidden | 1]
    # yields the denominator row-sum as one extra (free) MXU output lane.
    hidden = jnp.matmul(text, weight, preferred_element_type=jnp.float32)
    F_out_p = _round_up(F_out, 128)        # lane-dense, unmasked output stores
    F_acc = _round_up(F_out + 1, 128)      # lane-dense accumulator incl. ones column
    den_lane = F_out
    hid_aug = jnp.concatenate(
        [hidden.astype(kernel_dtype),
         jnp.ones((B, N, 1), kernel_dtype),
         jnp.zeros((B, N, F_acc - F_out - 1), kernel_dtype)],
        axis=-1)

    adj_k = adj.astype(kernel_dtype)
    b_p = jnp.pad(bias.astype(jnp.float32), (0, F_out_p - F_out)).reshape(1, F_out_p)

    # --- node-dim tiling: avoid the full-HBM adj pad whenever possible ---------
    if N <= block_n:
        bn, N_p = N, N                                # single full-extent node tile
    else:
        bn = next((c for c in range(block_n, 0, -128) if N % c == 0), None)
        if bn is not None:
            N_p = N                                   # exact tiling, no pad copy
        else:
            # TODO(synk): ragged edge tiles fall back to zero-padding adj (one
            # extra HBM copy); in-kernel edge masking would avoid it.
            bn, N_p = block_n, _round_up(N, block_n)
            adj_k = jnp.pad(adj_k, ((0, 0), (0, N_p - N), (0, N_p - N)))
            hid_aug = jnp.pad(hid_aug, ((0, 0), (0, N_p - N), (0, 0)))

    # --- batch blocking: bb divides B -> no batch padding, no zero-graph work ---
    bb = _largest_divisor_leq(B, block_b)

    # --- VMEM budget: shrink bb before exceeding a per-generation-safe cap ------
    def vmem_est(bb_):
        return (2 * bb_ * bn * bn * adj_k.dtype.itemsize                 # adj (2 bufs)
                + 2 * bb_ * bn * F_acc * hid_aug.dtype.itemsize          # hidden (2 bufs)
                + 2 * bb_ * bn * F_out_p * jnp.dtype(out_dtype).itemsize # out (2 bufs)
                + bb_ * bn * F_acc * 4                                   # f32 accumulator
                + 2 * F_out_p * 4)                                       # bias
    budget = 40 * (1 << 20)        # conservative: below v7x's 64 MiB physical VMEM
    while bb > 1 and vmem_est(bb) > budget:
        bb = _largest_divisor_leq(B, bb - 1)
    est = vmem_est(bb)
    vmem_limit = (min(int(est * 1.25) + (2 << 20), 64 * (1 << 20))
                  if est > 24 * (1 << 20) else None)

    grid = (B // bb, N_p // bn, N_p // bn)

    out = pl.pallas_call(
        functools.partial(_gcn_kernel, den_lane=den_lane, approx=not exact),
        out_shape=jax.ShapeDtypeStruct((B, N_p, F_out_p), out_dtype),
        grid_spec=pltpu.PrefetchScalarGridSpec(
            num_scalar_prefetch=0,
            grid=grid,
            in_specs=[
                # adj: (row-tile, k-tile) block — the HBM-bound stream
                pl.BlockSpec((bb, bn, bn), lambda b, i, k: (b, i, k)),
                # hidden (+ ones column): k-tile of node features
                pl.BlockSpec((bb, bn, F_acc), lambda b, i, k: (b, k, 0)),
                # bias: constant block index -> fetched once, VMEM-resident
                pl.BlockSpec((1, F_out_p), lambda b, i, k: (0, 0)),
            ],
            out_specs=pl.BlockSpec((bb, bn, F_out_p), lambda b, i, k: (b, i, 0)),
            scratch_shapes=[pltpu.VMEM((bb, bn, F_acc), jnp.float32)],
        ),
        compiler_params=pltpu.CompilerParams(
            # batch-block and row-tile axes shard across TCs (megacore);
            # the contraction axis is last and sequential.
            dimension_semantics=("parallel", "parallel", "arbitrary"),
            vmem_limit_bytes=vmem_limit,
        ),
    )(adj_k, hid_aug, b_p)

    return out[:, :N, :F_out]


def _reference(text, adj, weight, bias):
    hidden = jnp.matmul(text, weight)
    denom = jnp.sum(adj, axis=2, keepdims=True) + 1.0
    return jnp.matmul(adj, hidden) / denom + bias


if __name__ == "__main__":
    key = jax.random.PRNGKey(0)

    # --- Small, module-typical shapes: B=2, N=16, F_in=8, F_out=32 -------------
    B, N, F_in, F_out = 2, 16, 8, 32
    k1, k2, k3, k4, key = jax.random.split(key, 5)
    text = jax.random.normal(k1, (B, N, F_in), dtype=jnp.float32)
    adj = jax.random.uniform(k2, (B, N, N), dtype=jnp.float32)
    weight = jax.random.normal(k3, (F_in, F_out), dtype=jnp.float32) * 0.1
    bias = jax.random.normal(k4, (F_out,), dtype=jnp.float32) * 0.1
    ref = _reference(text, adj, weight, bias)

    # Default path: bf16 adj/hidden streaming, f32 accumulation (loose tolerance).
    out = jax.block_until_ready(graph_convolution(text, adj, weight, bias))
    assert out.shape == ref.shape and out.dtype == ref.dtype
    assert jnp.allclose(out, ref, atol=5e-3, rtol=5e-2), "mismatch (bf16 default)"

    # Exact f32 path.
    out_f32 = jax.block_until_ready(
        graph_convolution(text, adj, weight, bias, compute_dtype=jnp.float32))
    assert jnp.allclose(out_f32, ref, atol=1e-4, rtol=1e-4), "mismatch (f32)"

    # --- Multi-tile node dim + non-power-of-two batch ---------------------------
    # (exercises k accumulation, divisor-based bb=1, no adj padding: 256 % 128 == 0)
    B2, N2 = 3, 256
    k1, k2, key = jax.random.split(key, 3)
    text2 = jax.random.normal(k1, (B2, N2, F_in), dtype=jnp.float32)
    adj2 = jax.random.uniform(k2, (B2, N2, N2), dtype=jnp.float32)
    ref2 = _reference(text2, adj2, weight, bias)
    out2 = jax.block_until_ready(
        graph_convolution(text2, adj2, weight, bias, block_b=2, block_n=128))
    assert jnp.allclose(out2, ref2, atol=5e-3, rtol=5e-2), "mismatch (tiled bf16)"
    out2_f32 = jax.block_until_ready(
        graph_convolution(text2, adj2, weight, bias, block_b=2, block_n=128,
                          compute_dtype=jnp.float32))
    assert jnp.allclose(out2_f32, ref2, atol=1e-4, rtol=1e-4), "mismatch (tiled f32)"

    print("KERNEL_OK")
</pallas_src>

<mosaic_0001>
module attributes {stable_mosaic.version = 11 : i64} {
  func.func @_gcn_kernel(%arg0: i32, %arg1: i32, %arg2: i32, %arg3: memref<2x16x16xbf16, #tpu.memory_space<vmem>>, %arg4: memref<2x16x128xbf16, #tpu.memory_space<vmem>>, %arg5: memref<1x128xf32, #tpu.memory_space<vmem>>, %arg6: memref<2x16x128xf32, #tpu.memory_space<vmem>>, %arg7: memref<2x16x128xf32, #tpu.memory_space<vmem>>) attributes {dimension_semantics = [#tpu.dimension_semantics<parallel>, #tpu.dimension_semantics<parallel>, #tpu.dimension_semantics<arbitrary>], iteration_bounds = array<i64: 1, 1, 1>, scalar_prefetch = 0 : i64, scratch_operands = 1 : i64, tpu.core_type = #tpu.core_type<tc>, window_params = [{transform_indices = @transform_0, window_bounds = array<i64: 2, 16, 16>}, {transform_indices = @transform_1, window_bounds = array<i64: 2, 16, 128>}, {pipeline_mode = #tpu.pipeline_mode<synchronous>, transform_indices = @transform_2, window_bounds = array<i64: 1, 128>}, {transform_indices = @transform_3, window_bounds = array<i64: 2, 16, 128>}]} {
    %c0_i32 = arith.constant 0 : i32
    %0 = arith.cmpi eq, %arg2, %c0_i32 : i32
    %1 = arith.extui %0 : i1 to i32
    %c0_i32_0 = arith.constant 0 : i32
    %2 = arith.cmpi ne, %1, %c0_i32_0 : i32
    scf.if %2 {
      %cst_14 = arith.constant 0.000000e+00 : f32
      %12 = vector.broadcast %cst_14 : f32 to vector<2x16x128xf32>
      %c0_15 = arith.constant 0 : index
      %c0_16 = arith.constant 0 : index
      %c0_17 = arith.constant 0 : index
      %13 = vector.load %arg7[%c0_15, %c0_16, %c0_17] : memref<2x16x128xf32, #tpu.memory_space<vmem>>, vector<2x16x128xf32>
      tpu.vector_store %arg7[%c0_15, %c0_16, %c0_17], %12 {strides = array<i32>} : memref<2x16x128xf32, #tpu.memory_space<vmem>>, vector<2x16x128xf32>,
    } else {
    }
    %c0 = arith.constant 0 : index
    %c0_1 = arith.constant 0 : index
    %c0_2 = arith.constant 0 : index
    %3 = vector.load %arg7[%c0, %c0_1, %c0_2] : memref<2x16x128xf32, #tpu.memory_space<vmem>>, vector<2x16x128xf32>
    %c0_3 = arith.constant 0 : index
    %c0_4 = arith.constant 0 : index
    %c0_5 = arith.constant 0 : index
    %4 = vector.load %arg3[%c0_3, %c0_4, %c0_5] : memref<2x16x16xbf16, #tpu.memory_space<vmem>>, vector<2x16x16xbf16>
    %c0_6 = arith.constant 0 : index
    %c0_7 = arith.constant 0 : index
    %c0_8 = arith.constant 0 : index
    %5 = vector.load %arg4[%c0_6, %c0_7, %c0_8] : memref<2x16x128xbf16, #tpu.memory_space<vmem>>, vector<2x16x128xbf16>
    "tpu.trace_start"() <{level = 10 : i32, message = "bmk,bkf->bmf"}> : () -> ()
    %cst = arith.constant dense<0.000000e+00> : vector<2x16x128xf32>
    %6 = tpu.matmul %4, %5, %cst {dimension_numbers = #tpu.dot_dimension_numbers<[2], [1], [1], [2], [0, 0, 0, 1, 1, 2], [0], [0]>} : vector<2x16x16xbf16>, vector<2x16x128xbf16>, vector<2x16x128xf32> -> vector<2x16x128xf32>
    "tpu.trace_stop"() : () -> ()
    %7 = arith.addf %3, %6 : vector<2x16x128xf32>
    %c0_9 = arith.constant 0 : index
    %c0_10 = arith.constant 0 : index
    %c0_11 = arith.constant 0 : index
    %8 = vector.load %arg7[%c0_9, %c0_10, %c0_11] : memref<2x16x128xf32, #tpu.memory_space<vmem>>, vector<2x16x128xf32>
    tpu.vector_store %arg7[%c0_9, %c0_10, %c0_11], %7 {strides = array<i32>} : memref<2x16x128xf32, #tpu.memory_space<vmem>>, vector<2x16x128xf32>,
    %c0_i32_12 = arith.constant 0 : i32
    %9 = arith.cmpi eq, %arg2, %c0_i32_12 : i32
    %10 = arith.extui %9 : i1 to i32
    %c0_i32_13 = arith.constant 0 : i32
    %11 = arith.cmpi ne, %10, %c0_i32_13 : i32
    scf.if %11 {
      %c0_14 = arith.constant 0 : index
      %c0_15 = arith.constant 0 : index
      %c0_16 = arith.constant 0 : index
      %12 = vector.load %arg7[%c0_14, %c0_15, %c0_16] : memref<2x16x128xf32, #tpu.memory_space<vmem>>, vector<2x16x128xf32>
      %13 = vector.extract_strided_slice %12 {offsets = [0, 0, 32], sizes = [2, 16, 1], strides = [1, 1, 1]} : vector<2x16x128xf32> to vector<2x16x1xf32>
      %cst_17 = arith.constant 1.000000e+00 : f32
      %14 = vector.broadcast %cst_17 : f32 to vector<2x16x1xf32>
      %15 = arith.addf %13, %14 : vector<2x16x1xf32>
      %16 = tpu.reciprocal %15 {approx = true} : vector<2x16x1xf32> -> vector<2x16x1xf32>
      %17 = vector.broadcast %16 : vector<2x16x1xf32> to vector<2x16x128xf32>
      %18 = arith.mulf %12, %17 : vector<2x16x128xf32>
      %c0_18 = arith.constant 0 : index
      %c0_19 = arith.constant 0 : index
      %19 = vector.load %arg5[%c0_18, %c0_19] : memref<1x128xf32, #tpu.memory_space<vmem>>, vector<1x128xf32>
      %20 = vector.shape_cast %19 : vector<1x128xf32> to vector<1x1x128xf32>
      %21 = vector.broadcast %20 : vector<1x1x128xf32> to vector<2x16x128xf32>
      %22 = arith.addf %18, %21 : vector<2x16x128xf32>
      %c0_20 = arith.constant 0 : index
      %c0_21 = arith.constant 0 : index
      %c0_22 = arith.constant 0 : index
      %23 = vector.load %arg6[%c0_20, %c0_21, %c0_22] : memref<2x16x128xf32, #tpu.memory_space<vmem>>, vector<2x16x128xf32>
      tpu.vector_store %arg6[%c0_20, %c0_21, %c0_22], %22 {strides = array<i32>} : memref<2x16x128xf32, #tpu.memory_space<vmem>>, vector<2x16x128xf32>,
    } else {
    }
    return
  }
  func.func @transform_0(%arg0: i32, %arg1: i32, %arg2: i32) -> (i32, i32, i32) {
    %c0_i32 = arith.constant 0 : i32
    return %arg0, %arg1, %arg2 : i32, i32, i32
  }
  func.func @transform_1(%arg0: i32, %arg1: i32, %arg2: i32) -> (i32, i32, i32) {
    %c0_i32 = arith.constant 0 : i32
    %c0_i32_0 = arith.constant 0 : i32
    return %arg0, %arg2, %c0_i32 : i32, i32, i32
  }
  func.func @transform_2(%arg0: i32, %arg1: i32, %arg2: i32) -> (i32, i32) {
    %c0_i32 = arith.constant 0 : i32
    %c0_i32_0 = arith.constant 0 : i32
    %c0_i32_1 = arith.constant 0 : i32
    return %c0_i32, %c0_i32_0 : i32, i32
  }
  func.func @transform_3(%arg0: i32, %arg1: i32, %arg2: i32) -> (i32, i32, i32) {
    %c0_i32 = arith.constant 0 : i32
    %c0_i32_0 = arith.constant 0 : i32
    return %arg0, %arg1, %c0_i32 : i32, i32, i32
  }
}

</mosaic_0001>

<bundles_post_ra>
// kernel: tpu_custom_call.1
= control target key start
LH: loop header
LB: loop body
LE: loop exit
PB: predicated region body
PF: predicated region fallthrough
CT: control target
= control target key end

     0   :  { %8 = vsyncpa [#allocation4], 0  ;;  %s363_s0 = inlined_call_operand.hbm [shape: bf16[2,16,16], index: 0, kind: input, shape index: {}]   ;;  %s364_s1 = inlined_call_operand.hbm [shape: bf16[2,16,128], index: 1, kind: input, shape index: {}]   ;;  %s365_s2 = inlined_call_operand.vmem [shape: f32[1,128], index: 2, kind: input, shape index: {}]   ;;  %s366_s3 = inlined_call_operand.hbm [shape: f32[2,16,128], index: 3, kind: output, shape index: {}]  }
   0x1   :  { %9 = vsyncpa [#allocation7], 0 }
   0x2   :  { %10 = vsyncpa [#allocation5], 0  ;;  %s15_s14 = sshll.u32 %s363_s0, 4  ;;  %s323_s15 = smov [#allocation3]   ;;  %s16_s14 = int_to_ptr.hbm [resolvable:$true] %s15_s14 }
   0x3   :  { %s17_s16 = sshll.u32 %s323_s15, 4  ;;  %s28_s19 = sshll.u32 %s364_s1, 4  ;;  %s18_s16 = int_to_ptr.vmem [resolvable:$true] %s17_s16  ;;  %s29_s19 = int_to_ptr.hbm [resolvable:$true] %s28_s19 }
   0x4   :  { %s324_s20 = smov 64   ;;  %s325_s21 = smov 4  }
   0x5   :  { %23 = dma.hbm_to_vmem [thread:$0]  %s16_s14, 256, %s18_s16, [#allocation4], %s324_s20, %s324_s20, %s325_s21  }
   0x6   :  { %s326_s22 = smov [#allocation6]  }
   0x7   :  { %s30_s23 = sshll.u32 %s326_s22, 4  ;;  %s31_s23 = int_to_ptr.vmem [resolvable:$true] %s30_s23 }
   0x8   :  { %36 = dma.hbm_to_vmem [thread:$0]  %s29_s19, 256, %s31_s23, [#allocation7], %s324_s20, %s324_s20, %s325_s21  }
   0x9   :  { %317 = dma.done.wait [#allocation4], 256  }
   0xa   :  { %318 = vsyncadd [#allocation4], 4294967040 }
   0xb   :  { %319 = dma.done.wait [#allocation7], 256  }
   0xc   :  { %320 = vsyncadd [#allocation7], 4294967040  ;;  %v224_v0 = vld [vmem:[#allocation6] sm:$0xff]  ;;  %v225_v1 = vld [vmem:[#allocation6 + $0x8] sm:$0xff]  ;;  %vm79_vm0 = vcmask 130048   ;;  %v327_v4 = vmov 32  }
   0xd   :  { %v222_v2 = vld [vmem:[#allocation3] sm:$0xff]  ;;  %v223_v3 = vld [vmem:[#allocation3 + $0x8] sm:$0xff]  ;;  %90 = vmatpush.bf16.msra.mxu0 %v224_v0  ;;  %118 = vmatpush.bf16.msra.mxu1 %v225_v1  ;;  %s328_s24 = smov [#allocation8]   ;;  %s190_s28 = sshll.u32 %s366_s3, 4  ;;  %s191_s28 = int_to_ptr.hbm [resolvable:$true] %s190_s28 }
   0xe   :  { %235 = vset.pattern.permute.xlu1 %v327_v4  ;;  %234 = vset.pattern.permute.xlu0 %v327_v4  ;;  %v236_v17 = vld [vmem:[%s365_s2] ss:$0 sm:$0xff]  ;;  %s188_s25 = sshll.u32 %s328_s24, 4  ;;  %s329_s2 = smov 128   ;;  %s189_s25 = int_to_ptr.vmem [resolvable:$true] %s188_s25 }
   0xf   :  { %s330_s29 = smov 8  }
  0x10   :  { %212 = vmatmul.msk.bf16.vlgmr.msra.gmra.mxu0 %vm79_vm0, %v222_v2  ;;  %221 = vmatmul.msk.bf16.vlgmr.msra.gmra.mxu1 %vm79_vm0, %v223_v3 }
  0x8d   :  { %v92_v5 = vpop.f32.mrf.mxu0  ;;  %v120_v6 = vpop.f32.mrf.mxu1 }
  0x8e   :  { %v140_v7 = vadd.f32 1.0, %v92_v5  ;;  %v142_v8 = vadd.f32 1.0, %v120_v6 }
  0x90   :  { %237 = vrcp.f32 %v140_v7 }
  0x91   :  { %239 = vrcp.f32 %v142_v8 }
  0x95   :  { %v94_v9 = vpop.f32.mrf.mxu0  ;;  %v122_v10 = vpop.f32.mrf.mxu1 }
  0x96   :  { %v238_v11 = vpop.eup %237  ;;  %v141_v12 = vadd.f32 1.0, %v94_v9  ;;  %v143_v13 = vadd.f32 1.0, %v122_v10 }
  0x97   :  { %v240_v14 = vpop.eup %239  ;;  %150 = vperm.xlu0 %234, %v238_v11  }
  0x98   :  { %241 = vrcp.f32 %v141_v12  ;;  %160 = vperm.xlu1 %235, %v240_v14  }
  0x99   :  { %243 = vrcp.f32 %v143_v13 }
  0x9e   :  { %v242_v15 = vpop.eup %241 }
  0x9f   :  { %v244_v16 = vpop.eup %243  ;;  %155 = vperm.xlu0 %234, %v242_v15  }
  0xa0   :  { %165 = vperm.xlu1 %235, %v244_v16  }
 0x109   :  { %v151_v18 = vpop.permute.xlu0 %150 }
 0x10a   :  { %v161_v19 = vpop.permute.xlu1 %160  ;;  %v168_v20 = vmul.f32 %v151_v18, %v92_v5 }
 0x10b   :  { %v170_v21 = vmul.f32 %v161_v19, %v120_v6 }
 0x10c   :  { %v176_v22 = vadd.f32 %v236_v17, %v168_v20 }
 0x10d   :  { %v178_v23 = vadd.f32 %v236_v17, %v170_v21 }
 0x10e   :  { %180 = vst [vmem:[#allocation8] sm:$0xff] %v176_v22 }
 0x10f   :  { %182 = vst [vmem:[#allocation8 + $0x10] sm:$0xff] %v178_v23 }
 0x111   :  { %v156_v24 = vpop.permute.xlu0 %155 }
 0x112   :  { %v166_v25 = vpop.permute.xlu1 %165  ;;  %v169_v26 = vmul.f32 %v156_v24, %v94_v9 }
 0x113   :  { %v171_v27 = vmul.f32 %v166_v25, %v122_v10 }
 0x114   :  { %v177_v28 = vadd.f32 %v236_v17, %v169_v26 }
 0x115   :  { %v179_v29 = vadd.f32 %v236_v17, %v171_v27 }
 0x116   :  { %181 = vst [vmem:[#allocation8 + $0x8] sm:$0xff] %v177_v28 }
 0x117   :  { %183 = vst [vmem:[#allocation8 + $0x18] sm:$0xff] %v179_v29 }
 0x118   :  { %196 = dma.vmem_to_hbm [thread:$0]  %s189_s25, 512, %s191_s28, [#allocation5], %s329_s2, %s329_s2, %s330_s29  }
 0x119   :  { %321 = dma.done.wait [#allocation5], 512  }
 0x11a   :  { %322 = vsyncadd [#allocation5], 4294966784 }
 0x11b   :  { %201 = vsyncpa [#allocation4], 1 }
 0x11c   :  { %202 = vsyncpa [#allocation7], 1 }
 0x11d   :  { %203 = vsyncpa [#allocation5], 1 }

</bundles_post_ra>
